<compile_context>
chip_gen: v7x
topology: tpu7x:2x2x1
jax: 0.10.0
libtpu: 0.0.40
codegen_flags: <defaults>
</compile_context>

<pallas_src>
import functools

import numpy as np

import jax
import jax.numpy as jnp
from jax.experimental import pallas as pl
from jax.experimental.pallas import tpu as pltpu


_LANE = 128
_SUBLANE = 8


def _round_up(a: int, m: int) -> int:
    return (a + m - 1) // m * m


def _padded_length(n: int) -> int:
    return _round_up(max(n, 1), _LANE)


# -----------------------------------------------------------------------------
# HP operator: padded A^{-T} with A = I + lamb * D^T D. Host-side, f64, cached.
# -----------------------------------------------------------------------------
@functools.lru_cache(maxsize=None)
def _hp_operator_padded(n: int, n_pad: int, lamb: float) -> np.ndarray:
    d1 = np.zeros((n - 1, n), dtype=np.float64)
    d1[:, 1:] += np.eye(n - 1, dtype=np.float64)
    d1[:, :-1] -= np.eye(n - 1, dtype=np.float64)
    d2 = np.zeros((n - 2, n - 1), dtype=np.float64)
    d2[:, 1:] += np.eye(n - 2, dtype=np.float64)
    d2[:, :-1] -= np.eye(n - 2, dtype=np.float64)
    dd = d2 @ d1                                                  # (n-2, n)
    a = np.eye(n, dtype=np.float64) + lamb * (dd.T @ dd)          # SPD
    # TODO(synk): the dense SPD solve (torch.inverse in the module) has no clean
    # in-kernel Pallas equivalent; it is a pure constant of (N, lamb), solved
    # once on the host and cached.
    ainv = np.linalg.solve(a, np.eye(n, dtype=np.float64))
    m = np.zeros((n_pad, n_pad), dtype=np.float32)
    m[:n, :n] = ainv.T.astype(np.float32)                         # zero cross-blocks
    return m


# -----------------------------------------------------------------------------
# Generation-aware VMEM budget (v7x: 64 MiB physical, v5e/v6e: 128 MiB).
# -----------------------------------------------------------------------------
@functools.lru_cache(maxsize=1)
def _vmem_budget_bytes() -> int:
    cap = 0
    try:
        cap = int(pltpu.get_tpu_info().vmem_capacity_bytes)
    except Exception:
        cap = 0
    if cap <= 0:
        cap = 64 * 1024 * 1024          # conservative (v7x-sized) fallback
    # Leave headroom for compiler-internal scratch instead of requesting it all.
    return int(min(cap - 12 * 1024 * 1024, int(cap * 0.85)))


def _invariant_spec(shape, index_map):
    """BlockSpec for a grid-invariant input: single VMEM buffer is enough."""
    try:
        return pl.BlockSpec(shape, index_map, pipeline_mode=pl.Buffered(1))
    except TypeError:  # older BlockSpec signature without pipeline_mode
        return pl.BlockSpec(shape, index_map)


def _pick_row_tile(rows: int, tm_cap: int) -> int:
    tm_cap = max(_SUBLANE, (tm_cap // _SUBLANE) * _SUBLANE)
    tm = min(tm_cap, 1024, _round_up(rows, _SUBLANE))
    if rows >= 2 * _SUBLANE:
        # Keep at least two row tiles so both v7x TensorCores get work.
        tm = min(tm, _round_up((rows + 1) // 2, _SUBLANE))
    tm = max(_SUBLANE, (tm // _SUBLANE) * _SUBLANE)
    # Prefer a tile that divides the (8-aligned) row count so the last tile is
    # full; accept it only if it keeps at least half the tile size.
    rows8 = _round_up(rows, _SUBLANE)
    for cand in range(tm, max(_SUBLANE, tm // 2) - 1, -_SUBLANE):
        if rows8 % cand == 0:
            return cand
    return tm


# -----------------------------------------------------------------------------
# Kernels
# -----------------------------------------------------------------------------
def _hp_kernel_full(m_ref, x_ref, res_ref, g_ref):
    # m_ref : (Np, Np) padded A^{-T}, resident in VMEM (single buffer)
    # x_ref : (TM, Np) row tile of the flattened (B*C, Np) series
    x = x_ref[...]
    g = jnp.dot(x, m_ref[...], preferred_element_type=jnp.float32)  # MXU, lane-dense
    g_ref[...] = g
    res_ref[...] = x - g


def _hp_kernel_cols(m_ref, x_ref, res_ref, g_ref):
    # Large-N path: m_ref is an (Np, TN) column slab, x_ref a resident (TM, Np)
    # row tile; outputs are (TM, TN) column tiles.
    tn = g_ref.shape[-1]
    col0 = pl.multiple_of(pl.program_id(1) * tn, _LANE)
    g = jnp.dot(x_ref[...], m_ref[...], preferred_element_type=jnp.float32)
    g_ref[...] = g
    res_ref[...] = x_ref[:, pl.ds(col0, tn)] - g


# -----------------------------------------------------------------------------
# Forward
# -----------------------------------------------------------------------------
@functools.partial(jax.jit, static_argnames=("force_column_tiling",))
def _hp_filter_pallas(x, m_pad, *, force_column_tiling=False):
    b, c, n = x.shape
    n_pad = m_pad.shape[0]
    rows = b * c
    rows8 = _round_up(rows, _SUBLANE)

    x_rows = x.reshape(rows, n).astype(jnp.float32)
    padded = (rows8 != rows) or (n_pad != n)
    if padded:
        # One combined pad pass (rows to a multiple of 8, time axis to Np).
        x_rows = jnp.pad(x_rows, ((0, rows8 - rows), (0, n_pad - n)))

    budget = _vmem_budget_bytes()

    # 1-D path VMEM: single-buffered operator + double-buffered x/res/g tiles.
    m_full_bytes = 4 * n_pad * n_pad
    row_bytes = 3 * 2 * 4 * n_pad
    tm_cap_full = (budget - m_full_bytes) // row_bytes if budget > m_full_bytes else 0
    use_full = (not force_column_tiling) and tm_cap_full >= min(_LANE, rows8)

    cost = pl.CostEstimate(
        flops=2 * rows8 * n_pad * n_pad,
        transcendentals=0,
        bytes_accessed=4 * (3 * rows8 * n_pad + n_pad * n_pad),
    )

    if use_full:
        tm = _pick_row_tile(rows, tm_cap_full)
        grid = (pl.cdiv(rows8, tm),)
        in_specs = [
            _invariant_spec((n_pad, n_pad), lambda i: (0, 0)),   # A^{-T}, resident
            pl.BlockSpec((tm, n_pad), lambda i: (i, 0)),         # row tile of x
        ]
        out_specs = [
            pl.BlockSpec((tm, n_pad), lambda i: (i, 0)),         # res
            pl.BlockSpec((tm, n_pad), lambda i: (i, 0)),         # g
        ]
        kernel = _hp_kernel_full
        dims = ("parallel",)
    else:
        # Column-tiled fallback for operators too large to hold in VMEM.
        tn = _LANE if force_column_tiling else 0
        if not tn:
            for cand in (512, 384, 256, 128):
                if (n_pad % cand == 0 and
                        8 * n_pad * cand + 8 * _SUBLANE * n_pad + 16 * _SUBLANE * cand <= budget):
                    tn = cand
                    break
            tn = tn or _LANE
        tm_cap = (budget - 8 * n_pad * tn) // (8 * n_pad + 16 * tn)
        tm = _pick_row_tile(rows, max(tm_cap, _SUBLANE))
        grid = (pl.cdiv(rows8, tm), n_pad // tn)
        in_specs = [
            pl.BlockSpec((n_pad, tn), lambda i, j: (0, j)),      # operator slab streams
            pl.BlockSpec((tm, n_pad), lambda i, j: (i, 0)),      # x row tile, resident over j
        ]
        out_specs = [
            pl.BlockSpec((tm, tn), lambda i, j: (i, j)),         # res
            pl.BlockSpec((tm, tn), lambda i, j: (i, j)),         # g
        ]
        kernel = _hp_kernel_cols
        dims = ("parallel", "arbitrary")

    res_rows, g_rows = pl.pallas_call(
        kernel,
        out_shape=(
            jax.ShapeDtypeStruct((rows8, n_pad), jnp.float32),
            jax.ShapeDtypeStruct((rows8, n_pad), jnp.float32),
        ),
        grid_spec=pltpu.PrefetchScalarGridSpec(
            num_scalar_prefetch=0,
            grid=grid,
            in_specs=in_specs,
            out_specs=out_specs,
        ),
        compiler_params=pltpu.CompilerParams(
            dimension_semantics=dims,
            vmem_limit_bytes=budget,
        ),
        cost_estimate=cost,
    )(m_pad, x_rows)

    if padded:
        res_rows = res_rows[:rows, :n]
        g_rows = g_rows[:rows, :n]
    return res_rows.reshape(b, c, n), g_rows.reshape(b, c, n)


def hp_filter_forward(x: jax.Array, lamb: float, *, force_column_tiling: bool = False):
    """Hodrick-Prescott filter. x: (B, C, N). Returns (res, g), each (B, C, N)."""
    n = int(x.shape[-1])
    n_pad = _padded_length(n)
    m_pad = _hp_operator_padded(n, n_pad, float(lamb))            # cached host solve
    return _hp_filter_pallas(x, jnp.asarray(m_pad),
                             force_column_tiling=force_column_tiling)


# -----------------------------------------------------------------------------
# Self-test
# -----------------------------------------------------------------------------
if __name__ == "__main__":
    key = jax.random.PRNGKey(0)
    lamb = 1600.0  # classic HP-filter lambda (module's deterministic parameter)

    def reference(xv, lamb_v):
        nv = xv.shape[-1]
        mv = _hp_operator_padded(int(nv), _padded_length(int(nv)), float(lamb_v))[:nv, :nv]
        gv = jnp.einsum("bcm,mn->bcn", xv.astype(jnp.float32), jnp.asarray(mv),
                        precision=jax.lax.Precision.HIGHEST)
        return xv - gv, gv

    # Primary small-shape example (B, C, N) consistent with the module input.
    B, C, N = 2, 4, 16
    x = jax.random.normal(key, (B, C, N), dtype=jnp.float32)
    res, g = hp_filter_forward(x, lamb)
    res = jax.block_until_ready(res)
    g = jax.block_until_ready(g)
    res_ref, g_ref = reference(x, lamb)
    assert jnp.allclose(g, g_ref, atol=1e-4, rtol=1e-4)
    assert jnp.allclose(res, res_ref, atol=1e-4, rtol=1e-4)

    # Extra coverage: multi-row-tile grid, partial last row tile + N padding,
    # and the column-tiled large-N fallback (forced at a small shape).
    extra_cases = (
        ((4, 8, 16), False),    # two full row tiles (megacore-friendly grid)
        ((5, 8, 50), False),    # ragged row tiling + N padded to 128
        ((2, 3, 200), True),    # 2-D column-slab path (N padded to 256, TN=128)
    )
    for (b2, c2, n2), force in extra_cases:
        k2 = jax.random.fold_in(key, b2 * 1000 + c2 * 100 + n2 + int(force))
        x2 = jax.random.normal(k2, (b2, c2, n2), dtype=jnp.float32)
        r2, g2 = hp_filter_forward(x2, lamb, force_column_tiling=force)
        r2 = jax.block_until_ready(r2)
        g2 = jax.block_until_ready(g2)
        rr, gr = reference(x2, lamb)
        assert jnp.allclose(g2, gr, atol=1e-3, rtol=1e-3)
        assert jnp.allclose(r2, rr, atol=1e-3, rtol=1e-3)

    print("KERNEL_OK")
</pallas_src>

<mosaic_0001>
module attributes {stable_mosaic.version = 11 : i64} {
  func.func @_hp_kernel_full(%arg0: i32, %arg1: memref<128x128xf32, #tpu.memory_space<vmem>>, %arg2: memref<8x128xf32, #tpu.memory_space<vmem>>, %arg3: memref<8x128xf32, #tpu.memory_space<vmem>>, %arg4: memref<8x128xf32, #tpu.memory_space<vmem>>) attributes {dimension_semantics = [#tpu.dimension_semantics<parallel>], iteration_bounds = array<i64: 1>, scalar_prefetch = 0 : i64, scratch_operands = 0 : i64, tpu.core_type = #tpu.core_type<tc>, window_params = [{pipeline_mode = #tpu.pipeline_mode<synchronous>, transform_indices = @transform_0, window_bounds = array<i64: 128, 128>}, {transform_indices = @transform_1, window_bounds = array<i64: 8, 128>}, {transform_indices = @transform_2, window_bounds = array<i64: 8, 128>}, {transform_indices = @transform_3, window_bounds = array<i64: 8, 128>}]} {
    %c0 = arith.constant 0 : index
    %c0_0 = arith.constant 0 : index
    %0 = vector.load %arg2[%c0, %c0_0] : memref<8x128xf32, #tpu.memory_space<vmem>>, vector<8x128xf32>
    %c0_1 = arith.constant 0 : index
    %c0_2 = arith.constant 0 : index
    %1 = vector.load %arg1[%c0_1, %c0_2] : memref<128x128xf32, #tpu.memory_space<vmem>>, vector<128x128xf32>
    %cst = arith.constant dense<0.000000e+00> : vector<8x128xf32>
    %2 = tpu.matmul %0, %1, %cst {dimension_numbers = #tpu.dot_dimension_numbers<[1], [0], [0], [1], [0, 0, 1, 1], [], []>} : vector<8x128xf32>, vector<128x128xf32>, vector<8x128xf32> -> vector<8x128xf32>
    %c0_3 = arith.constant 0 : index
    %c0_4 = arith.constant 0 : index
    %3 = vector.load %arg4[%c0_3, %c0_4] : memref<8x128xf32, #tpu.memory_space<vmem>>, vector<8x128xf32>
    tpu.vector_store %arg4[%c0_3, %c0_4], %2 {strides = array<i32>} : memref<8x128xf32, #tpu.memory_space<vmem>>, vector<8x128xf32>,
    %4 = arith.subf %0, %2 : vector<8x128xf32>
    %c0_5 = arith.constant 0 : index
    %c0_6 = arith.constant 0 : index
    %5 = vector.load %arg3[%c0_5, %c0_6] : memref<8x128xf32, #tpu.memory_space<vmem>>, vector<8x128xf32>
    tpu.vector_store %arg3[%c0_5, %c0_6], %4 {strides = array<i32>} : memref<8x128xf32, #tpu.memory_space<vmem>>, vector<8x128xf32>,
    return
  }
  func.func @transform_0(%arg0: i32) -> (i32, i32) {
    %c0_i32 = arith.constant 0 : i32
    %c0_i32_0 = arith.constant 0 : i32
    %c0_i32_1 = arith.constant 0 : i32
    return %c0_i32, %c0_i32_0 : i32, i32
  }
  func.func @transform_1(%arg0: i32) -> (i32, i32) {
    %c0_i32 = arith.constant 0 : i32
    %c0_i32_0 = arith.constant 0 : i32
    return %arg0, %c0_i32 : i32, i32
  }
  func.func @transform_2(%arg0: i32) -> (i32, i32) {
    %c0_i32 = arith.constant 0 : i32
    %c0_i32_0 = arith.constant 0 : i32
    return %arg0, %c0_i32 : i32, i32
  }
  func.func @transform_3(%arg0: i32) -> (i32, i32) {
    %c0_i32 = arith.constant 0 : i32
    %c0_i32_0 = arith.constant 0 : i32
    return %arg0, %c0_i32 : i32, i32
  }
}

</mosaic_0001>

<bundles_post_ra>
// kernel: _hp_filter_pallas.1
= control target key start
LH: loop header
LB: loop body
LE: loop exit
PB: predicated region body
PF: predicated region fallthrough
CT: control target
= control target key end

     0   :  { %9 = vsyncpa [#allocation3], 0  ;;  %s371_s0 = inlined_call_operand.hbm [shape: f32[128,128], index: 0, kind: input, shape index: {}]   ;;  %s372_s1 = inlined_call_operand.vmem [shape: f32[8,128], index: 1, kind: input, shape index: {}]   ;;  %s373_s2 = inlined_call_operand.hbm [shape: f32[8,128], index: 2, kind: output, shape index: {0}]   ;;  %s374_s3 = inlined_call_operand.hbm [shape: f32[8,128], index: 3, kind: output, shape index: {1}]  }
   0x1   :  { %10 = vsyncpa [#allocation4], 0 }
   0x2   :  { %11 = vsyncpa [#allocation7], 0  ;;  %s304_s12 = smov [#allocation2]   ;;  %s232_s16 = scalar_lea.hbm %s371_s0, 2048 }
   0x3   :  { %s17_s13 = sshll.u32 %s304_s12, 4  ;;  %p233_p0 = scmp.ne.s32.totalorder %s371_s0, %s232_s16  ;;  %s18_s13 = int_to_ptr.vmem [resolvable:$true] %s17_s13 }
   0x4   :  { %p236_p1 = scmp.lt.u32.totalorder %s232_s16, %s371_s0 }
   0x6   :  { %p238_p2 = pnand %p236_p1, %p233_p0 }
   0x8   :  { %241 = shalt.err (!%p238_p2)
}
   0x9   :  { %s242_s21 = scalar_lea.vmem %s18_s13, 2048  ;;  %p247_p4 = scmp.lt.s32.totalorder %s18_s13, %s18_s13 }
   0xa   :  { %p243_p3 = scmp.ne.s32.totalorder %s18_s13, %s242_s21  ;;  %p248_p5 = scmp.lt.s32.totalorder %s242_s21, %s242_s21 }
   0xc   :  { %p249_p6 = por %p248_p5, %p247_p4 }
   0xe   :  { %p250_p7 = pnand %p249_p6, %p243_p3 }
  0x10   :  { %253 = shalt.err (!%p250_p7)
}
  0x11   :  { %s305_s22 = smov 128   ;;  %s306_s23 = smov 8  }
  0x12   :  { %23 = dma.hbm_to_vmem [thread:$0]  %s371_s0, 2048, %s18_s13, [#allocation3], %s305_s22, %s305_s22, %s306_s23  }
  0x13   :  { %298 = dma.done.wait [#allocation3], 2048  }
  0x14   :  { %299 = vsyncadd [#allocation3], 4294965248  ;;  %v307_v0 = vmov 0.0|0.0   ;;  %vm308_vm0 = vmmov 0   ;;  %v309_v1 = vmov 0.0   ;;  %v30_v2 = vld [vmem:[#allocation2] sm:$0xff] }
  0x15   :  { %200 = vmatprep.subr.bf16.mxu0 %v307_v0  ;;  %197 = vmatprep.mubr.msk.f32.mxu0 %vm308_vm0, %v309_v1  ;;  %v31_v3 = vld [vmem:[#allocation2 + $0x8] sm:$0xff]  ;;  %v32_v4 = vld [vmem:[#allocation2 + $0x10] sm:$0xff]  ;;  %v33_v6 = vld [vmem:[#allocation2 + $0x18] sm:$0xff]  ;;  %s310_s27 = smov [#allocation6]   ;;  %s311_s29 = smov [#allocation5]  }
  0x16   :  { %v201_v5 = vpack.c.bf16 %v31_v3, %v30_v2  ;;  %v204_v7 = vpack.c.bf16 %v33_v6, %v32_v4  ;;  %v34_v8 = vld [vmem:[#allocation2 + $0x20] sm:$0xff]  ;;  %v35_v9 = vld [vmem:[#allocation2 + $0x28] sm:$0xff]  ;;  %v36_v11 = vld [vmem:[#allocation2 + $0x30] sm:$0xff]  ;;  %s135_s28 = sshll.u32 %s310_s27, 4  ;;  %s125_s30 = sshll.u32 %s311_s29, 4  ;;  %s136_s28 = int_to_ptr.vmem [resolvable:$true] %s135_s28  ;;  %s126_s30 = int_to_ptr.vmem [resolvable:$true] %s125_s30 }
  0x17   :  { %v207_v10 = vpack.c.bf16 %v35_v9, %v34_v8  ;;  %v37_v12 = vld [vmem:[#allocation2 + $0x38] sm:$0xff]  ;;  %v38_v14 = vld [vmem:[#allocation2 + $0x40] sm:$0xff]  ;;  %v39_v15 = vld [vmem:[#allocation2 + $0x48] sm:$0xff]  ;;  %s254_s4 = scalar_lea.vmem %s136_s28, 128  ;;  %p259_p9 = scmp.lt.s32.totalorder %s136_s28, %s136_s28 }
  0x18   :  { %202 = vmatpush3.bf16.msra.mxu0 %v201_v5  ;;  %v210_v13 = vpack.c.bf16 %v37_v12, %v36_v11  ;;  %v213_v16 = vpack.c.bf16 %v39_v15, %v38_v14  ;;  %v40_v17 = vld [vmem:[#allocation2 + $0x50] sm:$0xff]  ;;  %v41_v18 = vld [vmem:[#allocation2 + $0x58] sm:$0xff]  ;;  %v42_v20 = vld [vmem:[#allocation2 + $0x60] sm:$0xff]  ;;  %p255_p8 = scmp.ne.s32.totalorder %s136_s28, %s254_s4  ;;  %p260_p10 = scmp.lt.s32.totalorder %s254_s4, %s254_s4 }
  0x19   :  { %203 = vmatprep.subr.bf16.mxu0 %v307_v0  ;;  %v216_v19 = vpack.c.bf16 %v41_v18, %v40_v17  ;;  %v43_v21 = vld [vmem:[#allocation2 + $0x68] sm:$0xff]  ;;  %v44_v23 = vld [vmem:[#allocation2 + $0x70] sm:$0xff]  ;;  %v45_v24 = vld [vmem:[#allocation2 + $0x78] sm:$0xff] }
  0x1a   :  { %v219_v22 = vpack.c.bf16 %v43_v21, %v42_v20  ;;  %v222_v25 = vpack.c.bf16 %v45_v24, %v44_v23  ;;  %v29_v26 = vld [vmem:[%s372_s1] sm:$0xff]  ;;  %p261_p11 = por %p260_p10, %p259_p9 }
  0x1c   :  { %205 = vmatpush3.bf16.msra.mxu0 %v204_v7  ;;  %p262_p12 = pnand %p261_p11, %p255_p8 }
  0x1d   :  { %206 = vmatprep.subr.bf16.mxu0 %v307_v0 }
  0x20   :  { %208 = vmatpush3.bf16.msra.mxu0 %v207_v10 }
  0x21   :  { %209 = vmatprep.subr.bf16.mxu0 %v307_v0 }
  0x24   :  { %211 = vmatpush3.bf16.msra.mxu0 %v210_v13 }
  0x25   :  { %212 = vmatprep.subr.bf16.mxu0 %v307_v0 }
  0x28   :  { %214 = vmatpush3.bf16.msra.mxu0 %v213_v16 }
  0x29   :  { %215 = vmatprep.subr.bf16.mxu0 %v307_v0 }
  0x2c   :  { %217 = vmatpush3.bf16.msra.mxu0 %v216_v19 }
  0x2d   :  { %218 = vmatprep.subr.bf16.mxu0 %v307_v0 }
  0x30   :  { %220 = vmatpush3.bf16.msra.mxu0 %v219_v22 }
  0x31   :  { %221 = vmatprep.subr.bf16.mxu0 %v307_v0 }
  0x34   :  { %223 = vmatpush3.bf16.msra.mxu0 %v222_v25 }
  0x37   :  { %198 = vmatmul.mubr.f32.vlgmr.msra.gmra.mrb[0].mxu0 %v29_v26 }
 0x10a   :  { %v112_v27 = vpop.f32.mrb[0].mxu0 }
 0x10b   :  { %v117_v28 = vsub.f32 %v29_v26, %v112_v27  ;;  %116 = vst [vmem:[#allocation6] sm:$0xff] %v112_v27  ;;  %v199_v29 = vpop.f32.mrb[1].mxu0 }
 0x10c   :  { %265 = shalt.err (!%p262_p12)
}
 0x10d   :  { %s266_s6 = scalar_lea.hbm %s374_s3, 128 }
 0x10e   :  { %p267_p13 = scmp.ne.s32.totalorder %s374_s3, %s266_s6  ;;  %p270_p0 = scmp.lt.u32.totalorder %s266_s6, %s374_s3 }
 0x110   :  { %p272_p1 = pnand %p270_p0, %p267_p13 }
 0x112   :  { %275 = shalt.err (!%p272_p1)
}
 0x113   :  { %138 = dma.vmem_to_hbm [thread:$0]  %s136_s28, 128, %s374_s3, [#allocation7]   ;;  %118 = vst [vmem:[#allocation5] sm:$0xff] %v117_v28 }
 0x114   :  { %s276_s13 = scalar_lea.vmem %s126_s30, 128  ;;  %p281_p3 = scmp.lt.s32.totalorder %s126_s30, %s126_s30 }
 0x115   :  { %p277_p2 = scmp.ne.s32.totalorder %s126_s30, %s276_s13  ;;  %p282_p4 = scmp.lt.s32.totalorder %s276_s13, %s276_s13 }
 0x117   :  { %p283_p5 = por %p282_p4, %p281_p3 }
 0x119   :  { %p284_p6 = pnand %p283_p5, %p277_p2 }
 0x11b   :  { %287 = shalt.err (!%p284_p6)
}
 0x11c   :  { %s288_s16 = scalar_lea.hbm %s373_s2, 128 }
 0x11d   :  { %p289_p7 = scmp.ne.s32.totalorder %s373_s2, %s288_s16  ;;  %p292_p8 = scmp.lt.u32.totalorder %s288_s16, %s373_s2 }
 0x11f   :  { %p294_p9 = pnand %p292_p8, %p289_p7 }
 0x121   :  { %297 = shalt.err (!%p294_p9)
}
 0x122   :  { %128 = dma.vmem_to_hbm [thread:$0]  %s126_s30, 128, %s373_s2, [#allocation4]  }
 0x123   :  { %300 = dma.done.wait [#allocation4], 128  }
 0x124   :  { %301 = vsyncadd [#allocation4], 4294967168 }
 0x125   :  { %302 = dma.done.wait [#allocation7], 128  }
 0x126   :  { %303 = vsyncadd [#allocation7], 4294967168 }
 0x127   :  { %145 = vsyncpa [#allocation3], 1 }
 0x128   :  { %146 = vsyncpa [#allocation4], 1 }
 0x129   :  { %147 = vsyncpa [#allocation7], 1 }

</bundles_post_ra>
